<compile_context>
chip_gen: v7x
topology: tpu7x:2x2x1
jax: 0.10.0
libtpu: 0.0.40
codegen_flags: <defaults>
</compile_context>

<pallas_src>
import functools
import math

import jax
import jax.numpy as jnp
from jax.experimental import pallas as pl
from jax.experimental.pallas import tpu as pltpu


def _round_up(x, m):
    return ((x + m - 1) // m) * m


# ---------------------------------------------------------------------------
# Stage 1: per-row-tile degree-scaled supports + hoisted X_C @ Wlin_x
# ---------------------------------------------------------------------------
def prep_kernel(xu_ref, xc_ref, deg_ref, ws_ref, pu_ref, wcw_ref, wlinx_ref,
                s_ref, xcw_ref):
    f32 = jnp.float32
    bf16 = jnp.bfloat16
    hp = xcw_ref.shape[1]

    xu = xu_ref[...]                       # (tp, Dp) bf16
    xc = xc_ref[...]                       # (tp, Dp) bf16
    duu = deg_ref[:, 0:1]                  # rsqrt(1 + rowsum(w_uu))
    dcc = deg_ref[:, 1:2]                  # rsqrt(1 + rowsum(w_cc))
    dc = deg_ref[:, 2:3]                   # rsqrt(colsum(w_uc))

    # GCN_S supports with the inner diag(d) folded into the support rows.
    su = duu * jnp.dot(xu, ws_ref[...], preferred_element_type=f32)
    sc1 = dcc * jnp.dot(xc, ws_ref[...], preferred_element_type=f32)

    # GCN_C support: X_U @ Pu @ Wc, scaled by the column degree of w_uc.
    pu_x = jnp.dot(xu, pu_ref[...], preferred_element_type=f32)
    sc2 = dc * jnp.dot(pu_x.astype(bf16), wcw_ref[...],
                       preferred_element_type=f32)

    # lane-aligned slice stores (each segment is a multiple of 128 lanes)
    s_ref[:, 0:hp] = su.astype(s_ref.dtype)
    s_ref[:, hp:2 * hp] = sc1.astype(s_ref.dtype)
    s_ref[:, 2 * hp:3 * hp] = sc2.astype(s_ref.dtype)

    # hoisted X_C @ Wlin_x term, shared by both attention branches (bf16 MXU)
    xcw_ref[...] = jnp.dot(xc, wlinx_ref[...], preferred_element_type=f32)


# ---------------------------------------------------------------------------
# Stage 2: tiled adjacency matmuls (k reduction last) + attention fusion
# ---------------------------------------------------------------------------
def hetgcn_main_kernel(wuu_ref, wcc_ref, wuc_ref, s_ref, xcw_ref, deg_ref,
                       wline_ref, a_ref, out_ref,
                       acc_u_ref, acc_c1_ref, acc_c2_ref,
                       *, tk, s_resident):
    f32 = jnp.float32
    bf16 = jnp.bfloat16
    k = pl.program_id(1)
    nk = pl.num_programs(1)
    tm, hp = acc_u_ref.shape

    @pl.when(k == 0)
    def _init():
        acc_u_ref[...] = jnp.zeros_like(acc_u_ref)
        acc_c1_ref[...] = jnp.zeros_like(acc_c1_ref)
        acc_c2_ref[...] = jnp.zeros_like(acc_c2_ref)

    if s_resident:
        # support slab is resident in VMEM for the whole grid; slice out the
        # current k tile (sublane offset is a multiple of tk).
        off = pl.multiple_of(k * tk, tk)
        su = s_ref[pl.ds(off, tk), 0:hp]
        sc1 = s_ref[pl.ds(off, tk), hp:2 * hp]
        sc2 = s_ref[pl.ds(off, tk), 2 * hp:3 * hp]
    else:
        su = s_ref[:, 0:hp]
        sc1 = s_ref[:, hp:2 * hp]
        sc2 = s_ref[:, 2 * hp:3 * hp]

    acc_u_ref[...] += jnp.dot(wuu_ref[...], su, preferred_element_type=f32)
    acc_c1_ref[...] += jnp.dot(wcc_ref[...], sc1, preferred_element_type=f32)
    acc_c2_ref[...] += jnp.dot(wuc_ref[...], sc2, preferred_element_type=f32)

    @pl.when(k == nk - 1)
    def _finalize():
        # outer D^{-1/2} row scalings (folded here instead of scaling (N,N))
        emb_u = deg_ref[:, 0:1] * acc_u_ref[...]
        emb_c1 = deg_ref[:, 1:2] * acc_c1_ref[...]
        emb_c2 = deg_ref[:, 3:4] * acc_c2_ref[...]

        xcw = xcw_ref[...]                                    # (tm, Hp) f32
        wline = wline_ref[...]                                # (Hp, Hp) bf16
        a_row = a_ref[...]                                    # (1, Hp)  f32
        lin1 = jnp.dot(emb_c1.astype(bf16), wline, preferred_element_type=f32)
        lin2 = jnp.dot(emb_c2.astype(bf16), wline, preferred_element_type=f32)
        t1 = jnp.sum(jnp.maximum(lin1 + xcw, 0.0) * a_row,
                     axis=-1, keepdims=True)
        t2 = jnp.sum(jnp.maximum(lin2 + xcw, 0.0) * a_row,
                     axis=-1, keepdims=True)
        # 2-way softmax over the attention taus
        m = jnp.maximum(t1, t2)
        e1 = jnp.exp(t1 - m)
        e2 = jnp.exp(t2 - m)
        inv = pl.reciprocal(e1 + e2, approx=True)
        y_c = (e1 * inv) * emb_c1
        y_u = (e2 * inv) * emb_c2

        # lane-aligned slice stores (segments sit on 128-lane boundaries)
        out_ref[:, 0:hp] = emb_u.astype(out_ref.dtype)
        out_ref[:, hp:2 * hp] = (y_c + y_u).astype(out_ref.dtype)
        out_ref[:, 2 * hp:3 * hp] = y_c.astype(out_ref.dtype)
        out_ref[:, 3 * hp:4 * hp] = y_u.astype(out_ref.dtype)


# ---------------------------------------------------------------------------
# Wrapper
# ---------------------------------------------------------------------------
def hetgcn_forward(xu, xc, wuu, wuc, wcc, params):
    N, D = xu.shape
    H = params["gcn_s_w"].shape[1]
    f32, bf16 = jnp.float32, jnp.bfloat16

    Dp = _round_up(D, 128)
    Hp = _round_up(H, 128)

    # ---- tile selection ----------------------------------------------------
    N8 = _round_up(N, 8)
    if N8 <= 256:
        Np = N8
        tp = tm = tk = Np                  # tiny: one tile per axis
    elif N8 <= 1024:
        Np = _round_up(N, 256)
        tp = tm = Np // 2                  # >=2 row tiles -> v7x megacore
        tk = Np
    else:
        Np = _round_up(N, 1024)
        tp = tm = 512
        tk = 1024

    # keep the support slab resident in VMEM if it (double-buffered) fits
    s_bytes = Np * 3 * Hp * 2              # bf16
    s_resident = 2 * s_bytes <= 24 * 1024 * 1024

    # ---- one-time degree reductions on UNPADDED inputs (padded rows -> 0) ---
    duu = jax.lax.rsqrt(1.0 + jnp.sum(wuu, axis=1))
    dcc = jax.lax.rsqrt(1.0 + jnp.sum(wcc, axis=1))
    du = jax.lax.rsqrt(jnp.sum(wuc, axis=1))     # row degree of w_uc
    dc = jax.lax.rsqrt(jnp.sum(wuc, axis=0))     # column degree of w_uc

    def pad2(x, r, c, dtype):
        return jnp.pad(x.astype(dtype),
                       ((0, r - x.shape[0]), (0, c - x.shape[1])))

    # pack the four per-row degree vectors into one lane-dense f32 slab
    deg = jnp.stack([duu, dcc, dc, du], axis=1).astype(f32)      # (N, 4)
    deg_p = jnp.pad(deg, ((0, Np - N), (0, 128 - 4)))            # (Np, 128)

    xu_p = pad2(xu, Np, Dp, bf16)
    xc_p = pad2(xc, Np, Dp, bf16)
    wuu_p = pad2(wuu, Np, Np, bf16)        # bf16 adjacency: halves HBM traffic
    wcc_p = pad2(wcc, Np, Np, bf16)
    wuc_p = pad2(wuc, Np, Np, bf16)
    # TODO(synk): optional int8 (v5e/v6e) / fp8 (v7x) adjacency would halve the
    # dominant HBM stream again; kept bf16 for exact reference-like semantics.

    ws_p = pad2(params["gcn_s_w"], Dp, Hp, bf16)
    pu_p = pad2(params["proj_u"], Dp, Hp, bf16)
    wcw_p = pad2(params["gcn_c_w"], Hp, Hp, bf16)
    wline_p = pad2(params["wlin_e"], Hp, Hp, bf16)
    wlinx_p = pad2(params["wlin_x"], Dp, Hp, bf16)
    a_p = pad2(params["a_row"], 1, Hp, f32)

    # ---- VMEM limit: ~3/4 of this chip's physical VMEM, capped at 100 MiB ---
    try:
        vmem_cap = int(pltpu.get_tpu_info().vmem_capacity_bytes)
        vmem_limit = min(vmem_cap * 3 // 4, 100 * 1024 * 1024)
    except Exception:
        vmem_limit = 48 * 1024 * 1024      # safe everywhere (v7x: 64 MiB/TC)

    cparams1 = pltpu.CompilerParams(dimension_semantics=("parallel",),
                                    vmem_limit_bytes=vmem_limit)
    cparams2 = pltpu.CompilerParams(
        dimension_semantics=("parallel", "arbitrary"),
        vmem_limit_bytes=vmem_limit)

    # ---- stage 1: scaled supports + hoisted X_C @ Wlin_x --------------------
    s_mat, xcw = pl.pallas_call(
        prep_kernel,
        grid=(Np // tp,),
        in_specs=[
            pl.BlockSpec((tp, Dp), lambda i: (i, 0)),      # X_U
            pl.BlockSpec((tp, Dp), lambda i: (i, 0)),      # X_C
            pl.BlockSpec((tp, 128), lambda i: (i, 0)),     # packed degrees
            pl.BlockSpec((Dp, Hp), lambda i: (0, 0)),      # Ws
            pl.BlockSpec((Dp, Hp), lambda i: (0, 0)),      # Pu
            pl.BlockSpec((Hp, Hp), lambda i: (0, 0)),      # Wc
            pl.BlockSpec((Dp, Hp), lambda i: (0, 0)),      # Wlin_x
        ],
        out_specs=(
            pl.BlockSpec((tp, 3 * Hp), lambda i: (i, 0)),
            pl.BlockSpec((tp, Hp), lambda i: (i, 0)),
        ),
        out_shape=(
            jax.ShapeDtypeStruct((Np, 3 * Hp), bf16),
            jax.ShapeDtypeStruct((Np, Hp), f32),
        ),
        compiler_params=cparams1,
    )(xu_p, xc_p, deg_p, ws_p, pu_p, wcw_p, wlinx_p)

    # ---- stage 2: tiled adjacency matmuls + attention fusion ----------------
    if s_resident:
        # whole support slab resident in VMEM across the grid (constant index)
        s_spec = pl.BlockSpec((Np, 3 * Hp), lambda i, k: (0, 0))
        s_reads = 1
    else:
        s_spec = pl.BlockSpec((tk, 3 * Hp), lambda i, k: (k, 0))
        s_reads = Np // tm

    flops = 2 * 3 * Np * Np * Hp + 2 * 2 * Np * Hp * Hp
    bytes_accessed = (3 * Np * Np * 2 + s_bytes * s_reads
                      + Np * 4 * Hp * 4 + Np * Hp * 4 + Np * 128 * 4)
    cost2 = pl.CostEstimate(flops=flops, transcendentals=2 * Np,
                            bytes_accessed=bytes_accessed)

    kern = functools.partial(hetgcn_main_kernel, tk=tk, s_resident=s_resident)
    out = pl.pallas_call(
        kern,
        grid=(Np // tm, Np // tk),
        in_specs=[
            pl.BlockSpec((tm, tk), lambda i, k: (i, k)),        # w_uu
            pl.BlockSpec((tm, tk), lambda i, k: (i, k)),        # w_cc
            pl.BlockSpec((tm, tk), lambda i, k: (i, k)),        # w_uc
            s_spec,                                             # supports
            pl.BlockSpec((tm, Hp), lambda i, k: (i, 0)),        # X_C @ Wlin_x
            pl.BlockSpec((tm, 128), lambda i, k: (i, 0)),       # packed degrees
            pl.BlockSpec((Hp, Hp), lambda i, k: (0, 0)),        # Wlin_e
            pl.BlockSpec((1, Hp), lambda i, k: (0, 0)),         # a
        ],
        out_specs=pl.BlockSpec((tm, 4 * Hp), lambda i, k: (i, 0)),
        out_shape=jax.ShapeDtypeStruct((Np, 4 * Hp), f32),
        scratch_shapes=[pltpu.VMEM((tm, Hp), f32) for _ in range(3)],
        compiler_params=cparams2,
        cost_estimate=cost2,
    )(wuu_p, wcc_p, wuc_p, s_mat, xcw, deg_p, wline_p, a_p)

    emb_u = out[:N, 0:H]
    emb_c = out[:N, Hp:Hp + H]
    y_c = out[:N, 2 * Hp:2 * Hp + H]
    y_u = out[:N, 3 * Hp:3 * Hp + H]
    return emb_u, emb_c, y_c, y_u


# ---------------------------------------------------------------------------
# Plain-JAX transcription of the PyTorch forward (for verification)
# ---------------------------------------------------------------------------
def reference(xu, xc, wuu, wuc, wcc, params):
    mm = functools.partial(jnp.matmul, precision=jax.lax.Precision.HIGHEST)

    def gcn_s(w, x):
        d = jnp.power(1.0 + jnp.sum(w, axis=1), -0.5)
        norm = mm(mm(jnp.diag(d), w), jnp.diag(d))
        return mm(norm, mm(x, params["gcn_s_w"]))

    emb_u = gcn_s(wuu, xu)
    emb_c1 = gcn_s(wcc, xc)

    du = jnp.diag(jnp.power(jnp.sum(wuc, axis=1), -0.5))
    dc = jnp.diag(jnp.power(jnp.sum(wuc, axis=0), -0.5))
    norm = mm(mm(du, wuc), dc)
    support = mm(mm(xu, params["proj_u"]), params["gcn_c_w"])
    emb_c2 = mm(norm, support)

    w_t = jnp.concatenate([params["wlin_e"], params["wlin_x"]], axis=0)

    def tau(emb):
        a_in = mm(jnp.concatenate([emb, xc], axis=-1), w_t)
        return mm(jax.nn.relu(a_in), params["a_row"].T)

    t = jnp.concatenate([tau(emb_c1), tau(emb_c2)], axis=1)
    e = jax.nn.softmax(t, axis=1)
    y_c = e[:, 0:1] * emb_c1
    y_u = e[:, 1:2] * emb_c2
    return emb_u, y_c + y_u, y_c, y_u


def glorot(key, fan_in, fan_out):
    r = math.sqrt(6.0 / (fan_in + fan_out))
    return jax.random.uniform(key, (fan_in, fan_out), jnp.float32, -r, r)


if __name__ == "__main__":
    # N_u == N_c == N (required by the attention cat), hidden_dim ==
    # output_dim == H (required by self.W), input_dim == D.
    N, D, H = 40, 20, 24

    key = jax.random.PRNGKey(0)
    keys = jax.random.split(key, 10)

    X_U = jax.random.normal(keys[0], (N, D), jnp.float32)
    X_C = jax.random.normal(keys[1], (N, D), jnp.float32)
    # nonnegative edge weights so degree^{-1/2} is well defined
    w_uu = jax.random.uniform(keys[2], (N, N), jnp.float32)
    w_uc = jax.random.uniform(keys[3], (N, N), jnp.float32)
    w_cc = jax.random.uniform(keys[4], (N, N), jnp.float32)

    params = {
        "gcn_s_w": glorot(keys[5], D, H),   # GCN_S.weight
        "proj_u":  glorot(keys[6], D, H),   # GCN_C.projection_u
        "gcn_c_w": glorot(keys[7], H, H),   # GCN_C.weight
    }
    # HetGCN.W : Linear(D + H, H, bias=False); stored transposed and pre-split
    wlin_t = glorot(keys[8], H + D, H)
    params["wlin_e"] = wlin_t[:H]           # rows multiplying the embedding
    params["wlin_x"] = wlin_t[H:]           # rows multiplying X_C
    # HetGCN.a : (H, 1) -> stored as a (1, H) row for lane-friendly layout
    params["a_row"] = glorot(keys[9], H, 1).T

    outs = jax.block_until_ready(
        hetgcn_forward(X_U, X_C, w_uu, w_uc, w_cc, params))
    refs = reference(X_U, X_C, w_uu, w_uc, w_cc, params)

    for o, r in zip(outs, refs):
        assert o.shape == r.shape and o.dtype == jnp.float32
        assert jnp.allclose(o, r, rtol=5e-2, atol=5e-2), "mismatch vs reference"

    print("KERNEL_OK")
</pallas_src>

<mosaic_0001>
module attributes {stable_mosaic.version = 11 : i64} {
  func.func @prep_kernel(%arg0: i32, %arg1: memref<40x128xbf16, #tpu.memory_space<vmem>>, %arg2: memref<40x128xbf16, #tpu.memory_space<vmem>>, %arg3: memref<40x128xf32, #tpu.memory_space<vmem>>, %arg4: memref<128x128xbf16, #tpu.memory_space<vmem>>, %arg5: memref<128x128xbf16, #tpu.memory_space<vmem>>, %arg6: memref<128x128xbf16, #tpu.memory_space<vmem>>, %arg7: memref<128x128xbf16, #tpu.memory_space<vmem>>, %arg8: memref<40x384xbf16, #tpu.memory_space<vmem>>, %arg9: memref<40x128xf32, #tpu.memory_space<vmem>>) attributes {dimension_semantics = [#tpu.dimension_semantics<parallel>], iteration_bounds = array<i64: 1>, scalar_prefetch = 0 : i64, scratch_operands = 0 : i64, tpu.core_type = #tpu.core_type<tc>, window_params = [{transform_indices = @transform_0, window_bounds = array<i64: 40, 128>}, {transform_indices = @transform_1, window_bounds = array<i64: 40, 128>}, {transform_indices = @transform_2, window_bounds = array<i64: 40, 128>}, {pipeline_mode = #tpu.pipeline_mode<synchronous>, transform_indices = @transform_3, window_bounds = array<i64: 128, 128>}, {pipeline_mode = #tpu.pipeline_mode<synchronous>, transform_indices = @transform_4, window_bounds = array<i64: 128, 128>}, {pipeline_mode = #tpu.pipeline_mode<synchronous>, transform_indices = @transform_5, window_bounds = array<i64: 128, 128>}, {pipeline_mode = #tpu.pipeline_mode<synchronous>, transform_indices = @transform_6, window_bounds = array<i64: 128, 128>}, {transform_indices = @transform_7, window_bounds = array<i64: 40, 384>}, {transform_indices = @transform_8, window_bounds = array<i64: 40, 128>}]} {
    %c0 = arith.constant 0 : index
    %c0_0 = arith.constant 0 : index
    %0 = vector.load %arg1[%c0, %c0_0] : memref<40x128xbf16, #tpu.memory_space<vmem>>, vector<40x128xbf16>
    %c0_1 = arith.constant 0 : index
    %c0_2 = arith.constant 0 : index
    %1 = vector.load %arg2[%c0_1, %c0_2] : memref<40x128xbf16, #tpu.memory_space<vmem>>, vector<40x128xbf16>
    %c0_3 = arith.constant 0 : index
    %c0_4 = arith.constant 0 : index
    %2 = vector.load %arg3[%c0_3, %c0_4] : memref<40x128xf32, #tpu.memory_space<vmem>>, vector<40x1xf32>
    %c0_5 = arith.constant 0 : index
    %c1 = arith.constant 1 : index
    %3 = vector.load %arg3[%c0_5, %c1] : memref<40x128xf32, #tpu.memory_space<vmem>>, vector<40x1xf32>
    %c0_6 = arith.constant 0 : index
    %c2 = arith.constant 2 : index
    %4 = vector.load %arg3[%c0_6, %c2] : memref<40x128xf32, #tpu.memory_space<vmem>>, vector<40x1xf32>
    %c0_7 = arith.constant 0 : index
    %c0_8 = arith.constant 0 : index
    %5 = vector.load %arg4[%c0_7, %c0_8] : memref<128x128xbf16, #tpu.memory_space<vmem>>, vector<128x128xbf16>
    %cst = arith.constant dense<0.000000e+00> : vector<40x128xf32>
    %6 = tpu.matmul %0, %5, %cst {dimension_numbers = #tpu.dot_dimension_numbers<[1], [0], [0], [1], [0, 0, 1, 1], [], []>} : vector<40x128xbf16>, vector<128x128xbf16>, vector<40x128xf32> -> vector<40x128xf32>
    %7 = vector.broadcast %2 : vector<40x1xf32> to vector<40x128xf32>
    %8 = arith.mulf %7, %6 : vector<40x128xf32>
    %c0_9 = arith.constant 0 : index
    %c0_10 = arith.constant 0 : index
    %9 = vector.load %arg4[%c0_9, %c0_10] : memref<128x128xbf16, #tpu.memory_space<vmem>>, vector<128x128xbf16>
    %cst_11 = arith.constant dense<0.000000e+00> : vector<40x128xf32>
    %10 = tpu.matmul %1, %9, %cst_11 {dimension_numbers = #tpu.dot_dimension_numbers<[1], [0], [0], [1], [0, 0, 1, 1], [], []>} : vector<40x128xbf16>, vector<128x128xbf16>, vector<40x128xf32> -> vector<40x128xf32>
    %11 = vector.broadcast %3 : vector<40x1xf32> to vector<40x128xf32>
    %12 = arith.mulf %11, %10 : vector<40x128xf32>
    %c0_12 = arith.constant 0 : index
    %c0_13 = arith.constant 0 : index
    %13 = vector.load %arg5[%c0_12, %c0_13] : memref<128x128xbf16, #tpu.memory_space<vmem>>, vector<128x128xbf16>
    %cst_14 = arith.constant dense<0.000000e+00> : vector<40x128xf32>
    %14 = tpu.matmul %0, %13, %cst_14 {dimension_numbers = #tpu.dot_dimension_numbers<[1], [0], [0], [1], [0, 0, 1, 1], [], []>} : vector<40x128xbf16>, vector<128x128xbf16>, vector<40x128xf32> -> vector<40x128xf32>
    %15 = arith.truncf %14 : vector<40x128xf32> to vector<40x128xbf16>
    %c0_15 = arith.constant 0 : index
    %c0_16 = arith.constant 0 : index
    %16 = vector.load %arg6[%c0_15, %c0_16] : memref<128x128xbf16, #tpu.memory_space<vmem>>, vector<128x128xbf16>
    %cst_17 = arith.constant dense<0.000000e+00> : vector<40x128xf32>
    %17 = tpu.matmul %15, %16, %cst_17 {dimension_numbers = #tpu.dot_dimension_numbers<[1], [0], [0], [1], [0, 0, 1, 1], [], []>} : vector<40x128xbf16>, vector<128x128xbf16>, vector<40x128xf32> -> vector<40x128xf32>
    %18 = vector.broadcast %4 : vector<40x1xf32> to vector<40x128xf32>
    %19 = arith.mulf %18, %17 : vector<40x128xf32>
    %20 = arith.truncf %8 : vector<40x128xf32> to vector<40x128xbf16>
    %c0_18 = arith.constant 0 : index
    %c0_19 = arith.constant 0 : index
    %21 = vector.load %arg8[%c0_18, %c0_19] : memref<40x384xbf16, #tpu.memory_space<vmem>>, vector<40x128xbf16>
    tpu.vector_store %arg8[%c0_18, %c0_19], %20 {strides = array<i32>} : memref<40x384xbf16, #tpu.memory_space<vmem>>, vector<40x128xbf16>,
    %22 = arith.truncf %12 : vector<40x128xf32> to vector<40x128xbf16>
    %c0_20 = arith.constant 0 : index
    %c128 = arith.constant 128 : index
    %23 = vector.load %arg8[%c0_20, %c128] : memref<40x384xbf16, #tpu.memory_space<vmem>>, vector<40x128xbf16>
    tpu.vector_store %arg8[%c0_20, %c128], %22 {strides = array<i32>} : memref<40x384xbf16, #tpu.memory_space<vmem>>, vector<40x128xbf16>,
    %24 = arith.truncf %19 : vector<40x128xf32> to vector<40x128xbf16>
    %c0_21 = arith.constant 0 : index
    %c256 = arith.constant 256 : index
    %25 = vector.load %arg8[%c0_21, %c256] : memref<40x384xbf16, #tpu.memory_space<vmem>>, vector<40x128xbf16>
    tpu.vector_store %arg8[%c0_21, %c256], %24 {strides = array<i32>} : memref<40x384xbf16, #tpu.memory_space<vmem>>, vector<40x128xbf16>,
    %c0_22 = arith.constant 0 : index
    %c0_23 = arith.constant 0 : index
    %26 = vector.load %arg7[%c0_22, %c0_23] : memref<128x128xbf16, #tpu.memory_space<vmem>>, vector<128x128xbf16>
    %cst_24 = arith.constant dense<0.000000e+00> : vector<40x128xf32>
    %27 = tpu.matmul %1, %26, %cst_24 {dimension_numbers = #tpu.dot_dimension_numbers<[1], [0], [0], [1], [0, 0, 1, 1], [], []>} : vector<40x128xbf16>, vector<128x128xbf16>, vector<40x128xf32> -> vector<40x128xf32>
    %c0_25 = arith.constant 0 : index
    %c0_26 = arith.constant 0 : index
    %28 = vector.load %arg9[%c0_25, %c0_26] : memref<40x128xf32, #tpu.memory_space<vmem>>, vector<40x128xf32>
    tpu.vector_store %arg9[%c0_25, %c0_26], %27 {strides = array<i32>} : memref<40x128xf32, #tpu.memory_space<vmem>>, vector<40x128xf32>,
    return
  }
  func.func @transform_0(%arg0: i32) -> (i32, i32) {
    %c0_i32 = arith.constant 0 : i32
    %c0_i32_0 = arith.constant 0 : i32
    return %arg0, %c0_i32 : i32, i32
  }
  func.func @transform_1(%arg0: i32) -> (i32, i32) {
    %c0_i32 = arith.constant 0 : i32
    %c0_i32_0 = arith.constant 0 : i32
    return %arg0, %c0_i32 : i32, i32
  }
  func.func @transform_2(%arg0: i32) -> (i32, i32) {
    %c0_i32 = arith.constant 0 : i32
    %c0_i32_0 = arith.constant 0 : i32
    return %arg0, %c0_i32 : i32, i32
  }
  func.func @transform_3(%arg0: i32) -> (i32, i32) {
    %c0_i32 = arith.constant 0 : i32
    %c0_i32_0 = arith.constant 0 : i32
    %c0_i32_1 = arith.constant 0 : i32
    return %c0_i32, %c0_i32_0 : i32, i32
  }
  func.func @transform_4(%arg0: i32) -> (i32, i32) {
    %c0_i32 = arith.constant 0 : i32
    %c0_i32_0 = arith.constant 0 : i32
    %c0_i32_1 = arith.constant 0 : i32
    return %c0_i32, %c0_i32_0 : i32, i32
  }
  func.func @transform_5(%arg0: i32) -> (i32, i32) {
    %c0_i32 = arith.constant 0 : i32
    %c0_i32_0 = arith.constant 0 : i32
    %c0_i32_1 = arith.constant 0 : i32
    return %c0_i32, %c0_i32_0 : i32, i32
  }
  func.func @transform_6(%arg0: i32) -> (i32, i32) {
    %c0_i32 = arith.constant 0 : i32
    %c0_i32_0 = arith.constant 0 : i32
    %c0_i32_1 = arith.constant 0 : i32
    return %c0_i32, %c0_i32_0 : i32, i32
  }
  func.func @transform_7(%arg0: i32) -> (i32, i32) {
    %c0_i32 = arith.constant 0 : i32
    %c0_i32_0 = arith.constant 0 : i32
    return %arg0, %c0_i32 : i32, i32
  }
  func.func @transform_8(%arg0: i32) -> (i32, i32) {
    %c0_i32 = arith.constant 0 : i32
    %c0_i32_0 = arith.constant 0 : i32
    return %arg0, %c0_i32 : i32, i32
  }
}

</mosaic_0001>

<bundles_post_ra>
// kernel: tpu_custom_call.1
= control target key start
LH: loop header
LB: loop body
LE: loop exit
PB: predicated region body
PF: predicated region fallthrough
CT: control target
= control target key end

     0   :  { %14 = vsyncpa [#allocation3], 0  ;;  %s1818_s0 = inlined_call_operand.hbm [shape: bf16[40,128], index: 0, kind: input, shape index: {}]   ;;  %s1819_s1 = inlined_call_operand.hbm [shape: bf16[40,128], index: 1, kind: input, shape index: {}]   ;;  %s1820_s2 = inlined_call_operand.hbm [shape: f32[40,128], index: 2, kind: input, shape index: {}]   ;;  %s1821_s3 = inlined_call_operand.hbm [shape: bf16[128,128], index: 3, kind: input, shape index: {}]   ;;  %s1822_s4 = inlined_call_operand.hbm [shape: bf16[128,128], index: 4, kind: input, shape index: {}]   ;;  %s1823_s5 = inlined_call_operand.hbm [shape: bf16[128,128], index: 5, kind: input, shape index: {}]   ;;  %s1824_s6 = inlined_call_operand.hbm [shape: bf16[128,128], index: 6, kind: input, shape index: {}]   ;;  %s1825_s7 = inlined_call_operand.hbm [shape: bf16[40,384], index: 7, kind: output, shape index: {0}]   ;;  %s1826_s8 = inlined_call_operand.hbm [shape: f32[40,128], index: 8, kind: output, shape index: {1}]  }
   0x1   :  { %15 = vsyncpa [#allocation6], 0 }
   0x2   :  { %16 = vsyncpa [#allocation9], 0 }
   0x3   :  { %17 = vsyncpa [#allocation12], 0 }
   0x4   :  { %18 = vsyncpa [#allocation4], 0 }
   0x5   :  { %19 = vsyncpa [#allocation16], 0  ;;  %s1464_s27 = smov [#allocation5]   ;;  %s1465_s29 = smov [#allocation8]  }
   0x6   :  { %s37_s28 = sshll.u32 %s1464_s27, 4  ;;  %s61_s30 = sshll.u32 %s1465_s29, 4  ;;  %s38_s28 = int_to_ptr.vmem [resolvable:$true] %s37_s28  ;;  %s1529_s30 = int_to_ptr.vmem [resolvable:$true] %s61_s30 }
   0x7   :  { %s1254_s11 = scalar_lea.hbm %s1819_s1, 320 }
   0x8   :  { %p1255_p0 = scmp.ne.s32.totalorder %s1819_s1, %s1254_s11  ;;  %p1258_p1 = scmp.lt.u32.totalorder %s1254_s11, %s1819_s1 }
   0xa   :  { %p1260_p2 = pnand %p1258_p1, %p1255_p0 }
   0xc   :  { %1263 = shalt.err (!%p1260_p2)
}
   0xd   :  { %s1264_s16 = scalar_lea.vmem %s38_s28, 320  ;;  %p1269_p4 = scmp.lt.s32.totalorder %s38_s28, %s38_s28 }
   0xe   :  { %p1265_p3 = scmp.ne.s32.totalorder %s38_s28, %s1264_s16  ;;  %p1270_p5 = scmp.lt.s32.totalorder %s1264_s16, %s1264_s16 }
  0x10   :  { %p1271_p6 = por %p1270_p5, %p1269_p4 }
  0x12   :  { %p1272_p7 = pnand %p1271_p6, %p1265_p3 }
  0x14   :  { %1275 = shalt.err (!%p1272_p7)
}
  0x15   :  { %s1466_s17 = smov 64   ;;  %s1467_s18 = smov 4  }
  0x16   :  { %43 = dma.hbm_to_vmem [thread:$0]  %s1819_s1, 320, %s38_s28, [#allocation6], %s1466_s17, %s1466_s17, %s1467_s18  }
  0x17   :  { %s1276_s23 = scalar_lea.hbm %s1821_s3, 1024 }
  0x18   :  { %p1277_p8 = scmp.ne.s32.totalorder %s1821_s3, %s1276_s23  ;;  %p1280_p9 = scmp.lt.u32.totalorder %s1276_s23, %s1821_s3 }
  0x1a   :  { %p1282_p10 = pnand %p1280_p9, %p1277_p8 }
  0x1c   :  { %1285 = shalt.err (!%p1282_p10)
}
  0x1d   :  { %s1286_s29 = scalar_lea.vmem %s1529_s30, 1024  ;;  %p1291_p12 = scmp.lt.s32.totalorder %s1529_s30, %s1529_s30 }
  0x1e   :  { %p1287_p11 = scmp.ne.s32.totalorder %s1529_s30, %s1286_s29  ;;  %p1292_p13 = scmp.lt.s32.totalorder %s1286_s29, %s1286_s29 }
  0x20   :  { %p1293_p0 = por %p1292_p13, %p1291_p12 }
  0x22   :  { %p1294_p1 = pnand %p1293_p0, %p1287_p11 }
  0x24   :  { %1297 = shalt.err (!%p1294_p1)
}
  0x25   :  { %67 = dma.hbm_to_vmem [thread:$0]  %s1821_s3, 1024, %s1529_s30, [#allocation9], %s1466_s17, %s1466_s17, %s1467_s18  }
  0x26   :  { %s1468_s9 = smov [#allocation11]   ;;  %s1469_s11 = smov [#allocation2]  }
  0x27   :  { %s85_s10 = sshll.u32 %s1468_s9, 4  ;;  %s25_s12 = sshll.u32 %s1469_s11, 4  ;;  %s86_s10 = int_to_ptr.vmem [resolvable:$true] %s85_s10  ;;  %s1566_s12 = int_to_ptr.vmem [resolvable:$true] %s25_s12 }
  0x28   :  { %s1298_s15 = scalar_lea.hbm %s1823_s5, 1024 }
  0x29   :  { %p1299_p2 = scmp.ne.s32.totalorder %s1823_s5, %s1298_s15  ;;  %p1302_p3 = scmp.lt.u32.totalorder %s1298_s15, %s1823_s5 }
  0x2b   :  { %p1304_p4 = pnand %p1302_p3, %p1299_p2 }
  0x2d   :  { %1307 = shalt.err (!%p1304_p4)
}
  0x2e   :  { %s1308_s3 = scalar_lea.vmem %s86_s10, 1024  ;;  %p1313_p6 = scmp.lt.s32.totalorder %s86_s10, %s86_s10 }
  0x2f   :  { %p1309_p5 = scmp.ne.s32.totalorder %s86_s10, %s1308_s3  ;;  %p1314_p7 = scmp.lt.s32.totalorder %s1308_s3, %s1308_s3 }
  0x31   :  { %p1315_p8 = por %p1314_p7, %p1313_p6 }
  0x33   :  { %p1316_p9 = pnand %p1315_p8, %p1309_p5 }
  0x35   :  { %1319 = shalt.err (!%p1316_p9)
}
  0x36   :  { %91 = dma.hbm_to_vmem [thread:$0]  %s1823_s5, 1024, %s86_s10, [#allocation12], %s1466_s17, %s1466_s17, %s1467_s18  }
  0x37   :  { %s1320_s25 = scalar_lea.hbm %s1818_s0, 320 }
  0x38   :  { %p1321_p10 = scmp.ne.s32.totalorder %s1818_s0, %s1320_s25  ;;  %p1324_p11 = scmp.lt.u32.totalorder %s1320_s25, %s1818_s0 }
  0x3a   :  { %p1326_p12 = pnand %p1324_p11, %p1321_p10 }
  0x3c   :  { %1329 = shalt.err (!%p1326_p12)
}
  0x3d   :  { %s1330_s28 = scalar_lea.vmem %s1566_s12, 320  ;;  %p1335_p0 = scmp.lt.s32.totalorder %s1566_s12, %s1566_s12 }
  0x3e   :  { %p1331_p13 = scmp.ne.s32.totalorder %s1566_s12, %s1330_s28  ;;  %p1336_p1 = scmp.lt.s32.totalorder %s1330_s28, %s1330_s28 }
  0x40   :  { %p1337_p2 = por %p1336_p1, %p1335_p0 }
  0x42   :  { %p1338_p3 = pnand %p1337_p2, %p1331_p13 }
  0x44   :  { %1341 = shalt.err (!%p1338_p3)
}
  0x45   :  { %31 = dma.hbm_to_vmem [thread:$0]  %s1818_s0, 320, %s1566_s12, [#allocation3], %s1466_s17, %s1466_s17, %s1467_s18  }
  0x46   :  { %s1470_s10 = smov [#allocation7]   ;;  %s1342_s15 = scalar_lea.hbm %s1820_s2, 640 }
  0x47   :  { %s49_s11 = sshll.u32 %s1470_s10, 4  ;;  %p1343_p4 = scmp.ne.s32.totalorder %s1820_s2, %s1342_s15  ;;  %s50_s11 = int_to_ptr.vmem [resolvable:$true] %s49_s11 }
  0x48   :  { %p1346_p5 = scmp.lt.u32.totalorder %s1342_s15, %s1820_s2 }
  0x4a   :  { %p1348_p6 = pnand %p1346_p5, %p1343_p4 }
  0x4c   :  { %1351 = shalt.err (!%p1348_p6)
}
  0x4d   :  { %s1352_s3 = scalar_lea.vmem %s50_s11, 640  ;;  %p1357_p8 = scmp.lt.s32.totalorder %s50_s11, %s50_s11 }
  0x4e   :  { %p1353_p7 = scmp.ne.s32.totalorder %s50_s11, %s1352_s3  ;;  %p1358_p9 = scmp.lt.s32.totalorder %s1352_s3, %s1352_s3 }
  0x50   :  { %p1359_p10 = por %p1358_p9, %p1357_p8 }
  0x52   :  { %p1360_p11 = pnand %p1359_p10, %p1353_p7 }
  0x54   :  { %1363 = shalt.err (!%p1360_p11)
}
  0x55   :  { %s1471_s0 = smov 128   ;;  %s1472_s12 = smov 8  }
  0x56   :  { %55 = dma.hbm_to_vmem [thread:$0]  %s1820_s2, 640, %s50_s11, [#allocation6], %s1471_s0, %s1471_s0, %s1472_s12  }
  0x57   :  { %s1473_s23 = smov [#allocation10]   ;;  %s1474_s25 = smov [#allocation13]  }
  0x58   :  { %s73_s24 = sshll.u32 %s1473_s23, 4  ;;  %s97_s26 = sshll.u32 %s1474_s25, 4  ;;  %s74_s24 = int_to_ptr.vmem [resolvable:$true] %s73_s24  ;;  %s98_s26 = int_to_ptr.vmem [resolvable:$true] %s97_s26 }
  0x59   :  { %s1364_s1 = scalar_lea.hbm %s1822_s4, 1024 }
  0x5a   :  { %p1365_p12 = scmp.ne.s32.totalorder %s1822_s4, %s1364_s1  ;;  %p1368_p13 = scmp.lt.u32.totalorder %s1364_s1, %s1822_s4 }
  0x5c   :  { %p1370_p0 = pnand %p1368_p13, %p1365_p12 }
  0x5e   :  { %1373 = shalt.err (!%p1370_p0)
}
  0x5f   :  { %s1374_s2 = scalar_lea.vmem %s74_s24, 1024  ;;  %p1379_p2 = scmp.lt.s32.totalorder %s74_s24, %s74_s24 }
  0x60   :  { %p1375_p1 = scmp.ne.s32.totalorder %s74_s24, %s1374_s2  ;;  %p1380_p3 = scmp.lt.s32.totalorder %s1374_s2, %s1374_s2 }
  0x62   :  { %p1381_p4 = por %p1380_p3, %p1379_p2 }
  0x64   :  { %p1382_p5 = pnand %p1381_p4, %p1375_p1 }
  0x66   :  { %1385 = shalt.err (!%p1382_p5)
}
  0x67   :  { %79 = dma.hbm_to_vmem [thread:$0]  %s1822_s4, 1024, %s74_s24, [#allocation9], %s1466_s17, %s1466_s17, %s1467_s18  }
  0x68   :  { %s1386_s16 = scalar_lea.hbm %s1824_s6, 1024 }
  0x69   :  { %p1387_p6 = scmp.ne.s32.totalorder %s1824_s6, %s1386_s16  ;;  %p1390_p7 = scmp.lt.u32.totalorder %s1386_s16, %s1824_s6 }
  0x6b   :  { %p1392_p8 = pnand %p1390_p7, %p1387_p6 }
  0x6d   :  { %1395 = shalt.err (!%p1392_p8)
}
  0x6e   :  { %s1396_s30 = scalar_lea.vmem %s98_s26, 1024  ;;  %p1401_p10 = scmp.lt.s32.totalorder %s98_s26, %s98_s26 }
  0x6f   :  { %p1397_p9 = scmp.ne.s32.totalorder %s98_s26, %s1396_s30  ;;  %p1402_p11 = scmp.lt.s32.totalorder %s1396_s30, %s1396_s30 }
  0x71   :  { %p1403_p12 = por %p1402_p11, %p1401_p10 }
  0x73   :  { %p1404_p13 = pnand %p1403_p12, %p1397_p9 }
  0x75   :  { %1407 = shalt.err (!%p1404_p13)
}
  0x76   :  { %103 = dma.hbm_to_vmem [thread:$0]  %s1824_s6, 1024, %s98_s26, [#allocation12], %s1466_s17, %s1466_s17, %s1467_s18  }
  0x77   :  { %1452 = dma.done.wait [#allocation3], 320  }
  0x78   :  { %1453 = vsyncadd [#allocation3], 4294966976 }
  0x79   :  { %1454 = dma.done.wait [#allocation6], 960  }
  0x7a   :  { %1455 = vsyncadd [#allocation6], 4294966336 }
  0x7b   :  { %1456 = dma.done.wait [#allocation9], 2048  }
  0x7c   :  { %1457 = vsyncadd [#allocation9], 4294965248 }
  0x7d   :  { %1458 = dma.done.wait [#allocation12], 2048  }
  0x7e   :  { %1459 = vsyncadd [#allocation12], 4294965248  ;;  %v1475_v0 = vmov 0.0   ;;  %vm1476_vm0 = vmmov 0   ;;  %v1477_v1 = vmov 0   ;;  %v1216_v2 = vld [vmem:[#allocation8] sm:$0xff]  }
  0x7f   :  { %1034 = vmatprep.subr.bf16.mxu0 %v1475_v0  ;;  %1050 = vmatprep.mubr.msk.bf16.mxu0 %vm1476_vm0, %v1475_v0  ;;  %v1217_v3 = vld [vmem:[#allocation8 + $0x8] sm:$0xff]   ;;  %v1218_v4 = vld [vmem:[#allocation8 + $0x10] sm:$0xff]   ;;  %v1219_v5 = vld [vmem:[#allocation8 + $0x18] sm:$0xff]   ;;  %v1478_v45 = vmov 1   ;;  %v1479_v46 = vmov 2   ;;  %s1480_s6 = smov [#allocation14]  }
  0x80   :  { %1210 = vset.pattern.permute.xlu0 %v1477_v1  ;;  %1211 = vset.pattern.permute.xlu1 %v1477_v1  ;;  %v1220_v6 = vld [vmem:[#allocation8 + $0x20] sm:$0xff]   ;;  %v1221_v7 = vld [vmem:[#allocation8 + $0x28] sm:$0xff]   ;;  %v1662_v8 = vld [vmem:[#allocation7] sm:$0xff]  ;;  %s880_s17 = sshll.u32 %s1480_s6, 4  ;;  %s881_s17 = int_to_ptr.vmem [resolvable:$true] %s880_s17 }
  0x81   :  { %1062 = vmatprep.subr.bf16.mxu1 %v1475_v0  ;;  %1078 = vmatprep.mubr.msk.bf16.mxu1 %vm1476_vm0, %v1475_v0  ;;  %v1666_v9 = vld [vmem:[#allocation7 + $0x8] sm:$0xff]  ;;  %v1668_v10 = vld [vmem:[#allocation7 + $0x10] sm:$0xff]  ;;  %v1222_v11 = vld [vmem:[#allocation8 + $0x30] sm:$0xff]   ;;  %s1408_s18 = scalar_lea.vmem %s881_s17, 960  ;;  %p1413_p1 = scmp.lt.s32.totalorder %s881_s17, %s881_s17 }
  0x82   :  { %1035 = vmatpush3.bf16.msra.mxu0 %v1216_v2  ;;  %1063 = vmatpush3.bf16.msra.mxu1 %v1216_v2  ;;  %v1671_v12 = vld [vmem:[#allocation7 + $0x18] sm:$0xff]  ;;  %v1674_v13 = vld [vmem:[#allocation7 + $0x20] sm:$0xff]  ;;  %v1225_v16 = vld [vmem:[#allocation10] sm:$0xff]   ;;  %p1409_p0 = scmp.ne.s32.totalorder %s881_s17, %s1408_s18  ;;  %p1414_p2 = scmp.lt.s32.totalorder %s1408_s18, %s1408_s18 }
  0x83   :  { %1036 = vmatprep.subr.bf16.mxu0 %v1475_v0  ;;  %1064 = vmatprep.subr.bf16.mxu1 %v1475_v0  ;;  %v1223_v14 = vld [vmem:[#allocation8 + $0x38] sm:$0xff]   ;;  %v1224_v15 = vld [vmem:[#allocation2] sm:$0xff]   ;;  %v1226_v17 = vld [vmem:[#allocation10 + $0x8] sm:$0xff]  }
  0x84   :  { %279 = vperm.xlu0 %1210, %v1662_v8   ;;  %289 = vperm.xlu1 %1211, %v1668_v10   ;;  %v1228_v18 = vld [vmem:[#allocation2 + $0x8] sm:$0xff]   ;;  %v1227_v19 = vld [vmem:[#allocation10 + $0x10] sm:$0xff]   ;;  %v1231_v21 = vld [vmem:[#allocation2 + $0x10] ss:$0 sps:$4 sm:$0xff]   ;;  %p1415_p3 = por %p1414_p2, %p1413_p1 }
  0x85   :  { %v1229_v20 = vld [vmem:[#allocation10 + $0x18] sm:$0xff]   ;;  %v1230_v22 = vld [vmem:[#allocation10 + $0x20] sm:$0xff]   ;;  %v1232_v23 = vld [vmem:[#allocation10 + $0x28] sm:$0xff]  }
  0x86   :  { %1037 = vmatpush3.bf16.msra.mxu0 %v1217_v3  ;;  %1065 = vmatpush3.bf16.msra.mxu1 %v1217_v3  ;;  %v1233_v24 = vld [vmem:[#allocation10 + $0x30] sm:$0xff]   ;;  %v1234_v25 = vld [vmem:[#allocation10 + $0x38] sm:$0xff]   ;;  %v1235_v26 = vld [vmem:[#allocation5] sm:$0xff]   ;;  %p1416_p4 = pnand %p1415_p3, %p1409_p0 }
  0x87   :  { %1038 = vmatprep.subr.bf16.mxu0 %v1475_v0  ;;  %1066 = vmatprep.subr.bf16.mxu1 %v1475_v0  ;;  %v1236_v27 = vld [vmem:[#allocation11] sm:$0xff]   ;;  %v1237_v28 = vld [vmem:[#allocation11 + $0x8] sm:$0xff]   ;;  %v1238_v29 = vld [vmem:[#allocation11 + $0x10] sm:$0xff]  }
  0x88   :  { %284 = vperm.xlu0 %1210, %v1666_v9   ;;  %294 = vperm.xlu1 %1211, %v1671_v12   ;;  %v1239_v30 = vld [vmem:[#allocation11 + $0x18] sm:$0xff]   ;;  %v1710_v31 = vld [vmem:[#allocation5 + $0x8] sm:$0xff]   ;;  %v1241_v32 = vld [vmem:[#allocation11 + $0x20] sm:$0xff]  }
  0x89   :  { %v1242_v33 = vld [vmem:[#allocation11 + $0x28] sm:$0xff]   ;;  %v1717_v34 = vld [vmem:[#allocation5 + $0x10] ss:$0 sps:$4 sm:$0xff]   ;;  %v1245_v36 = vld [vmem:[#allocation11 + $0x38] sm:$0xff]  }
  0x8a   :  { %1039 = vmatpush3.bf16.msra.mxu0 %v1218_v4  ;;  %1067 = vmatpush3.bf16.msra.mxu1 %v1218_v4  ;;  %v1244_v35 = vld [vmem:[#allocation11 + $0x30] sm:$0xff]   ;;  %v1725_v37 = vld [vmem:[#allocation13] sm:$0xff]   ;;  %v1729_v38 = vld [vmem:[#allocation13 + $0x8] sm:$0xff]  }
  0x8b   :  { %1040 = vmatprep.subr.bf16.mxu0 %v1475_v0  ;;  %1068 = vmatprep.subr.bf16.mxu1 %v1475_v0  ;;  %v1733_v39 = vld [vmem:[#allocation13 + $0x10] sm:$0xff]   ;;  %v1737_v40 = vld [vmem:[#allocation13 + $0x18] sm:$0xff]   ;;  %v1741_v41 = vld [vmem:[#allocation13 + $0x20] sm:$0xff]  }
  0x8c   :  { %299 = vperm.xlu0 %1210, %v1674_v13   ;;  %v1745_v42 = vld [vmem:[#allocation13 + $0x28] sm:$0xff]   ;;  %v1749_v43 = vld [vmem:[#allocation13 + $0x30] sm:$0xff]   ;;  %v1753_v44 = vld [vmem:[#allocation13 + $0x38] sm:$0xff]   ;;  %1212 = vset.pattern.permute.xlu1 %v1478_v45 }
  0x8d   :  { %380 = vperm.xlu1 %1212, %v1662_v8  }
  0x8e   :  { %1041 = vmatpush3.bf16.msra.mxu0 %v1219_v5  ;;  %1069 = vmatpush3.bf16.msra.mxu1 %v1219_v5 }
  0x8f   :  { %1042 = vmatprep.subr.bf16.mxu0 %v1475_v0  ;;  %1070 = vmatprep.subr.bf16.mxu1 %v1475_v0 }
  0x90   :  { %1213 = vset.pattern.permute.xlu0 %v1478_v45 }
  0x91   :  { %384 = vperm.xlu0 %1213, %v1666_v9   ;;  %388 = vperm.xlu1 %1212, %v1668_v10  }
  0x92   :  { %1043 = vmatpush3.bf16.msra.mxu0 %v1220_v6  ;;  %1071 = vmatpush3.bf16.msra.mxu1 %v1220_v6 }
  0x93   :  { %1044 = vmatprep.subr.bf16.mxu0 %v1475_v0  ;;  %1072 = vmatprep.subr.bf16.mxu1 %v1475_v0 }
  0x95   :  { %396 = vperm.xlu0 %1213, %v1674_v13   ;;  %392 = vperm.xlu1 %1212, %v1671_v12  }
  0x96   :  { %1045 = vmatpush3.bf16.msra.mxu0 %v1221_v7  ;;  %1073 = vmatpush3.bf16.msra.mxu1 %v1221_v7 }
  0x97   :  { %1046 = vmatprep.subr.bf16.mxu0 %v1475_v0  ;;  %1074 = vmatprep.subr.bf16.mxu1 %v1475_v0 }
  0x99   :  { %1215 = vset.pattern.permute.xlu0 %v1479_v46  ;;  %1214 = vset.pattern.permute.xlu1 %v1479_v46 }
  0x9a   :  { %1047 = vmatpush3.bf16.msra.mxu0 %v1222_v11  ;;  %1075 = vmatpush3.bf16.msra.mxu1 %v1222_v11 }
  0x9b   :  { %1048 = vmatprep.subr.bf16.mxu0 %v1475_v0  ;;  %1076 = vmatprep.subr.bf16.mxu1 %v1475_v0 }
  0x9c   :  { %652 = vperm.xlu0 %1215, %v1666_v9   ;;  %648 = vperm.xlu1 %1214, %v1662_v8  }
  0x9e   :  { %1049 = vmatpush3.bf16.msra.mxu0 %v1223_v14  ;;  %1077 = vmatpush3.bf16.msra.mxu1 %v1223_v14 }
  0x9f   :  { %1090 = vmatprep.subr.bf16.mxu0 %v1475_v0  ;;  %1118 = vmatprep.subr.bf16.mxu1 %v1475_v0 }
  0xa0   :  { %664 = vperm.xlu0 %1215, %v1674_v13   ;;  %656 = vperm.xlu1 %1214, %v1668_v10  }
  0xa1   :  { %1051 = vmatmul.mubr.bf16.vlgmr.msra.gmra.mrb[0].mxu0 %v1224_v15  ;;  %1079 = vmatmul.mubr.bf16.vlgmr.msra.gmra.mrb[0].mxu1 %v1235_v26 }
  0xa2   :  { %1091 = vmatpush3.bf16.msra.mxu0 %v1225_v16  ;;  %1054 = vmatprep.mubr.msk.bf16.mxu0 %vm1476_vm0, %v1475_v0 }
  0xa3   :  { %1092 = vmatprep.subr.bf16.mxu0 %v1475_v0  ;;  %1082 = vmatprep.mubr.msk.bf16.mxu1 %vm1476_vm0, %v1475_v0 }
  0xa4   :  { %1119 = vmatpush3.bf16.msra.mxu1 %v1236_v27  ;;  %660 = vperm.xlu1 %1214, %v1671_v12  }
  0xa5   :  { %1120 = vmatprep.subr.bf16.mxu1 %v1475_v0 }
  0xa6   :  { %1093 = vmatpush3.bf16.msra.mxu0 %v1226_v17 }
  0xa7   :  { %1094 = vmatprep.subr.bf16.mxu0 %v1475_v0 }
  0xa8   :  { %1121 = vmatpush3.bf16.msra.mxu1 %v1237_v28 }
  0xa9   :  { %1055 = vmatmul.mubr.bf16.gmra.mrb[4].mxu0 %v1228_v18  ;;  %1122 = vmatprep.subr.bf16.mxu1 %v1475_v0 }
  0xaa   :  { %1095 = vmatpush3.bf16.msra.mxu0 %v1227_v19  ;;  %1058 = vmatprep.mubr.msk.bf16.mxu0 %vm1476_vm0, %v1475_v0 }
  0xab   :  { %1096 = vmatprep.subr.bf16.mxu0 %v1475_v0  ;;  %1083 = vmatmul.mubr.bf16.gmra.mrb[4].mxu1 %v1710_v31 }
  0xac   :  { %1123 = vmatpush3.bf16.msra.mxu1 %v1238_v29  ;;  %1086 = vmatprep.mubr.msk.bf16.mxu1 %vm1476_vm0, %v1475_v0 }
  0xad   :  { %1124 = vmatprep.subr.bf16.mxu1 %v1475_v0 }
  0xae   :  { %1097 = vmatpush3.bf16.msra.mxu0 %v1229_v20 }
  0xaf   :  { %1098 = vmatprep.subr.bf16.mxu0 %v1475_v0 }
  0xb0   :  { %1125 = vmatpush3.bf16.msra.mxu1 %v1239_v30 }
  0xb1   :  { %1059 = vmatmul.mubr.bf16.gmra.mrb[8].mxu0 %v1231_v21  ;;  %1126 = vmatprep.subr.bf16.mxu1 %v1475_v0 }
  0xb2   :  { %1099 = vmatpush3.bf16.msra.mxu0 %v1230_v22  ;;  %1106 = vmatprep.mubr.msk.bf16.mxu0 %vm1476_vm0, %v1475_v0 }
  0xb3   :  { %1100 = vmatprep.subr.bf16.mxu0 %v1475_v0  ;;  %1087 = vmatmul.mubr.bf16.gmra.mrb[8].mxu1 %v1717_v34 }
  0xb4   :  { %1127 = vmatpush3.bf16.msra.mxu1 %v1241_v32  ;;  %1134 = vmatprep.mubr.msk.bf16.mxu1 %vm1476_vm0, %v1475_v0 }
  0xb5   :  { %1128 = vmatprep.subr.bf16.mxu1 %v1475_v0 }
  0xb6   :  { %1101 = vmatpush3.bf16.msra.mxu0 %v1232_v23 }
  0xb7   :  { %1102 = vmatprep.subr.bf16.mxu0 %v1475_v0 }
  0xb8   :  { %1129 = vmatpush3.bf16.msra.mxu1 %v1242_v33 }
  0xb9   :  { %1130 = vmatprep.subr.bf16.mxu1 %v1475_v0 }
  0xba   :  { %1103 = vmatpush3.bf16.msra.mxu0 %v1233_v24 }
  0xbb   :  { %1104 = vmatprep.subr.bf16.mxu0 %v1475_v0 }
  0xbc   :  { %1131 = vmatpush3.bf16.msra.mxu1 %v1244_v35 }
  0xbd   :  { %1132 = vmatprep.subr.bf16.mxu1 %v1475_v0 }
  0xbe   :  { %1105 = vmatpush3.bf16.msra.mxu0 %v1234_v25 }
  0xbf   :  { %1146 = vmatprep.subr.bf16.mxu0 %v1475_v0 }
  0xc0   :  { %1133 = vmatpush3.bf16.msra.mxu1 %v1245_v36 }
  0xc1   :  { %1107 = vmatmul.mubr.bf16.vlgmr.msra.gmra.mrb[12].mxu0 %v1224_v15  ;;  %1174 = vmatprep.subr.bf16.mxu1 %v1475_v0 }
  0xc2   :  { %1110 = vmatprep.mubr.msk.bf16.mxu0 %vm1476_vm0, %v1475_v0  ;;  %1147 = vmatpush3.bf16.msra.mxu0 %v1725_v37 }
  0xc3   :  { %1148 = vmatprep.subr.bf16.mxu0 %v1475_v0 }
  0xc6   :  { %1149 = vmatpush3.bf16.msra.mxu0 %v1729_v38 }
  0xc7   :  { %1150 = vmatprep.subr.bf16.mxu0 %v1475_v0 }
  0xc9   :  { %1111 = vmatmul.mubr.bf16.gmra.mrb[16].mxu0 %v1228_v18 }
  0xca   :  { %1114 = vmatprep.mubr.msk.bf16.mxu0 %vm1476_vm0, %v1475_v0  ;;  %1151 = vmatpush3.bf16.msra.mxu0 %v1733_v39 }
  0xcb   :  { %1152 = vmatprep.subr.bf16.mxu0 %v1475_v0 }
  0xce   :  { %1153 = vmatpush3.bf16.msra.mxu0 %v1737_v40 }
  0xcf   :  { %1154 = vmatprep.subr.bf16.mxu0 %v1475_v0 }
  0xd1   :  { %1115 = vmatmul.mubr.bf16.gmra.mrb[20].mxu0 %v1231_v21 }
  0xd2   :  { %1162 = vmatprep.mubr.msk.bf16.mxu0 %vm1476_vm0, %v1475_v0  ;;  %1155 = vmatpush3.bf16.msra.mxu0 %v1741_v41 }
  0xd3   :  { %1156 = vmatprep.subr.bf16.mxu0 %v1475_v0 }
  0xd6   :  { %1157 = vmatpush3.bf16.msra.mxu0 %v1745_v42 }
  0xd7   :  { %1158 = vmatprep.subr.bf16.mxu0 %v1475_v0 }
  0xda   :  { %1159 = vmatpush3.bf16.msra.mxu0 %v1749_v43 }
  0xdb   :  { %1160 = vmatprep.subr.bf16.mxu0 %v1475_v0 }
  0xde   :  { %1161 = vmatpush3.bf16.msra.mxu0 %v1753_v44 }
  0xe1   :  { %1163 = vmatmul.mubr.bf16.vlgmr.msra.gmra.mrb[24].mxu0 %v1235_v26 }
 0x103   :  { %v280_v47 = vpop.permute.xlu0 %279  ;;  %v290_v53 = vpop.permute.xlu1 %289 }
 0x107   :  { %v285_v49 = vpop.permute.xlu0 %284  ;;  %v295_v59 = vpop.permute.xlu1 %294 }
 0x10b   :  { %v300_v4 = vpop.permute.xlu0 %299 }
 0x10c   :  { %v381_v26 = vpop.permute.xlu1 %380 }
 0x110   :  { %v385_v28 = vpop.permute.xlu0 %384 }
 0x114   :  { %v397_v45 = vpop.permute.xlu0 %396 }
 0x174   :  { %v255_v48 = vpop.f32.mrb[0].mxu0  ;;  %v357_v27 = vpop.f32.mrb[0].mxu1 }
 0x175   :  { %v302_v50 = vmul.f32 %v280_v47, %v255_v48  ;;  %v1052_v51 = vpop.f32.mrb[1].mxu0  ;;  %v1080_v29 = vpop.f32.mrb[1].mxu1  ;;  %v399_v30 = vmul.f32 %v381_v26, %v357_v27 }
 0x176   :  { %v258_v52 = vpop.f32.mrb[2].mxu0  ;;  %v360_v32 = vpop.f32.mrb[2].mxu1 }
 0x177   :  { %v964_v54 = vpack.c.bf16 %v302_v50, %v302_v50  ;;  %v303_v55 = vmul.f32 %v285_v49, %v258_v52  ;;  %v1053_v56 = vpop.f32.mrb[3].mxu0  ;;  %v969_v33 = vpack.c.bf16 %v399_v30, %v399_v30  ;;  %v400_v35 = vmul.f32 %v385_v28, %v360_v32  ;;  %v1081_v36 = vpop.f32.mrb[3].mxu1 }
 0x179   :  { %693 = vst [vmem:[#allocation14] sm:$0xf] %v964_v54  ;;  %v965_v57 = vpack.c.bf16 %v303_v55, %v303_v55  ;;  %719 = vst [vmem:[#allocation14 + $0x4] sm:$0xf] %v969_v33 }
 0x17b   :  { %694 = vst [vmem:[#allocation14 + $0xc] sm:$0xf] %v965_v57 }
 0x17c   :  { %v263_v58 = vpop.f32.mrb[4].mxu0 }
 0x17d   :  { %v304_v60 = vmul.f32 %v290_v53, %v263_v58  ;;  %v1056_v61 = vpop.f32.mrb[5].mxu0  ;;  %v653_v58 = vpop.permute.xlu0 %652 }
 0x17e   :  { %v266_v62 = vpop.f32.mrb[6].mxu0 }
 0x17f   :  { %v966_v63 = vpack.c.bf16 %v304_v60, %v304_v60  ;;  %v305_v1 = vmul.f32 %v295_v59, %v266_v62  ;;  %v1057_v2 = vpop.f32.mrb[7].mxu0 }
 0x181   :  { %695 = vst [vmem:[#allocation14 + $0x18] sm:$0xf] %v966_v63  ;;  %v967_v3 = vpack.c.bf16 %v305_v1, %v305_v1 }
 0x183   :  { %696 = vst [vmem:[#allocation14 + $0x24] sm:$0xf] %v967_v3 }
 0x184   :  { %v271_v5 = vpop.f32.mrb[8].mxu0 }
 0x185   :  { %v1060_v6 = vpop.f32.mrb[9].mxu0  ;;  %v306_v7 = vmul.f32 %v300_v4, %v271_v5 }
 0x186   :  { %v274_v8 = vpop.f32.mrb[10].mxu0 }
 0x187   :  { %v968_v9 = vpack.c.bf16 %v306_v7, %v306_v7  ;;  %v1061_v10 = vpop.f32.mrb[11].mxu0 }
 0x189   :  { %697 = vst [vmem:[#allocation14 + $0x30] sm:$0xf] %v968_v9 }
 0x194   :  { %v502_v11 = vpop.f32.mrb[12].mxu0 }
 0x195   :  { %v1108_v12 = vpop.f32.mrb[13].mxu0 }
 0x196   :  { %v505_v13 = vpop.f32.mrb[14].mxu0 }
 0x197   :  { %v524_v14 = vpack.c.bf16 %v505_v13, %v502_v11  ;;  %v1109_v15 = vpop.f32.mrb[15].mxu0  ;;  %v665_v13 = vpop.permute.xlu0 %664 }
 0x199   :  { %1135 = vmatmul.mubr.bf16.vlgmr.msra.gmra.mrb[12].mxu1 %v524_v14 }
 0x19a   :  { %1182 = vmatpush3.bf16.msra.mxu1 %v1725_v37  ;;  %1138 = vmatprep.mubr.msk.bf16.mxu1 %vm1476_vm0, %v1475_v0  ;;  %v970_v37 = vpack.c.bf16 %v400_v35, %v400_v35 }
 0x19b   :  { %1175 = vmatprep.subr.bf16.mxu1 %v1475_v0 }
 0x19c   :  { %v510_v16 = vpop.f32.mrb[16].mxu0  ;;  %720 = vst [vmem:[#allocation14 + $0x10] sm:$0xf] %v970_v37 }
 0x19d   :  { %v1112_v17 = vpop.f32.mrb[17].mxu0 }
 0x19e   :  { %1183 = vmatpush3.bf16.msra.mxu1 %v1729_v38  ;;  %v513_v18 = vpop.f32.mrb[18].mxu0  ;;  %v389_v38 = vpop.permute.xlu1 %388 }
 0x19f   :  { %v525_v19 = vpack.c.bf16 %v513_v18, %v510_v16  ;;  %1176 = vmatprep.subr.bf16.mxu1 %v1475_v0  ;;  %v1113_v20 = vpop.f32.mrb[19].mxu0 }
 0x1a1   :  { %1139 = vmatmul.mubr.bf16.gmra.mrb[16].mxu1 %v525_v19 }
 0x1a2   :  { %1184 = vmatpush3.bf16.msra.mxu1 %v1733_v39  ;;  %1142 = vmatprep.mubr.msk.bf16.mxu1 %vm1476_vm0, %v1475_v0  ;;  %v365_v39 = vpop.f32.mrb[4].mxu1 }
 0x1a3   :  { %1177 = vmatprep.subr.bf16.mxu1 %v1475_v0 }
 0x1a4   :  { %v518_v21 = vpop.f32.mrb[20].mxu0 }
 0x1a5   :  { %v526_v22 = vpack.c.bf16 %v518_v21, %v518_v21  ;;  %v1116_v23 = vpop.f32.mrb[21].mxu0 }
 0x1a6   :  { %1185 = vmatpush3.bf16.msra.mxu1 %v1737_v40  ;;  %v521_v24 = vpop.f32.mrb[22].mxu0  ;;  %v401_v40 = vmul.f32 %v389_v38, %v365_v39 }
 0x1a7   :  { %1178 = vmatprep.subr.bf16.mxu1 %v1475_v0  ;;  %v1117_v25 = vpop.f32.mrb[23].mxu0 }
 0x1a9   :  { %1143 = vmatmul.mubr.bf16.gmra.mrb[20].mxu1 %v526_v22 }
 0x1aa   :  { %1186 = vmatpush3.bf16.msra.mxu1 %v1741_v41  ;;  %1166 = vmatprep.mubr.msk.bf16.mxu1 %vm1476_vm0, %v1475_v0  ;;  %v1084_v41 = vpop.f32.mrb[5].mxu1 }
 0x1ab   :  { %1179 = vmatprep.subr.bf16.mxu1 %v1475_v0 }
 0x1ae   :  { %1187 = vmatpush3.bf16.msra.mxu1 %v1745_v42  ;;  %v971_v42 = vpack.c.bf16 %v401_v40, %v401_v40 }
 0x1af   :  { %1180 = vmatprep.subr.bf16.mxu1 %v1475_v0 }
 0x1b0   :  { %721 = vst [vmem:[#allocation14 + $0x1c] sm:$0xf] %v971_v42 }
 0x1b2   :  { %1188 = vmatpush3.bf16.msra.mxu1 %v1749_v43 }
 0x1b3   :  { %1181 = vmatprep.subr.bf16.mxu1 %v1475_v0 }
 0x1b4   :  { %v848_v52 = vpop.f32.mrb[24].mxu0 }
 0x1b5   :  { %870 = vst [vmem:[#allocation15] sm:$0xff] %v848_v52  ;;  %v1164_v53 = vpop.f32.mrb[25].mxu0 }
 0x1b6   :  { %1189 = vmatpush3.bf16.msra.mxu1 %v1753_v44  ;;  %v851_v54 = vpop.f32.mrb[26].mxu0 }
 0x1b7   :  { %871 = vst [vmem:[#allocation15 + $0x8] sm:$0xff] %v851_v54  ;;  %v1165_v55 = vpop.f32.mrb[27].mxu0 }
 0x1b9   :  { %1167 = vmatmul.mubr.bf16.vlgmr.msra.gmra.mrb[24].mxu1 %v1710_v31  ;;  %v393_v31 = vpop.permute.xlu1 %392 }
 0x1ba   :  { %1170 = vmatprep.mubr.msk.bf16.mxu1 %vm1476_vm0, %v1475_v0  ;;  %v368_v0 = vpop.f32.mrb[6].mxu1 }
 0x1bb   :  { %v1085_v43 = vpop.f32.mrb[7].mxu1 }
 0x1bc   :  { %v373_v46 = vpop.f32.mrb[8].mxu1 }
 0x1bd   :  { %v1088_v47 = vpop.f32.mrb[9].mxu1  ;;  %v403_v48 = vmul.f32 %v397_v45, %v373_v46  ;;  %v649_v56 = vpop.permute.xlu1 %648 }
 0x1be   :  { %v376_v49 = vpop.f32.mrb[10].mxu1 }
 0x1bf   :  { %v973_v50 = vpack.c.bf16 %v403_v48, %v403_v48  ;;  %v1089_v51 = vpop.f32.mrb[11].mxu1 }
 0x1c1   :  { %1171 = vmatmul.mubr.bf16.gmra.mrb[28].mxu1 %v1717_v34  ;;  %v402_v34 = vmul.f32 %v393_v31, %v368_v0  ;;  %723 = vst [vmem:[#allocation14 + $0x34] sm:$0xf] %v973_v50  ;;  %v657_v62 = vpop.permute.xlu1 %656 }
 0x1c3   :  { %v972_v44 = vpack.c.bf16 %v402_v34, %v402_v34 }
 0x1c5   :  { %722 = vst [vmem:[#allocation14 + $0x28] sm:$0xf] %v972_v44  ;;  %v661_v5 = vpop.permute.xlu1 %660 }
 0x26c   :  { %v625_v57 = vpop.f32.mrb[12].mxu1 }
 0x26d   :  { %v667_v59 = vmul.f32 %v649_v56, %v625_v57  ;;  %v1136_v60 = vpop.f32.mrb[13].mxu1 }
 0x26e   :  { %v628_v61 = vpop.f32.mrb[14].mxu1 }
 0x26f   :  { %v974_v63 = vpack.c.bf16 %v667_v59, %v667_v59  ;;  %v668_v1 = vmul.f32 %v653_v58, %v628_v61  ;;  %v1137_v2 = vpop.f32.mrb[15].mxu1 }
 0x271   :  { %745 = vst [vmem:[#allocation14 + $0x8] sm:$0xf] %v974_v63  ;;  %v975_v3 = vpack.c.bf16 %v668_v1, %v668_v1 }
 0x273   :  { %746 = vst [vmem:[#allocation14 + $0x14] sm:$0xf] %v975_v3 }
 0x274   :  { %v633_v4 = vpop.f32.mrb[16].mxu1 }
 0x275   :  { %v669_v6 = vmul.f32 %v657_v62, %v633_v4  ;;  %v1140_v7 = vpop.f32.mrb[17].mxu1 }
 0x276   :  { %v636_v8 = vpop.f32.mrb[18].mxu1 }
 0x277   :  { %v976_v9 = vpack.c.bf16 %v669_v6, %v669_v6  ;;  %v670_v10 = vmul.f32 %v661_v5, %v636_v8  ;;  %v1141_v11 = vpop.f32.mrb[19].mxu1 }
 0x279   :  { %747 = vst [vmem:[#allocation14 + $0x20] sm:$0xf] %v976_v9  ;;  %v977_v12 = vpack.c.bf16 %v670_v10, %v670_v10 }
 0x27b   :  { %748 = vst [vmem:[#allocation14 + $0x2c] sm:$0xf] %v977_v12 }
 0x27c   :  { %v641_v14 = vpop.f32.mrb[20].mxu1 }
 0x27d   :  { %v1144_v15 = vpop.f32.mrb[21].mxu1  ;;  %v671_v16 = vmul.f32 %v665_v13, %v641_v14 }
 0x27e   :  { %v644_v17 = vpop.f32.mrb[22].mxu1 }
 0x27f   :  { %v978_v18 = vpack.c.bf16 %v671_v16, %v671_v16  ;;  %v1145_v19 = vpop.f32.mrb[23].mxu1 }
 0x281   :  { %749 = vst [vmem:[#allocation14 + $0x38] sm:$0xf] %v978_v18 }
 0x282   :  { %1419 = shalt.err (!%p1416_p4)
}
 0x283   :  { %s1420_s25 = scalar_lea.hbm %s1825_s7, 960 }
 0x284   :  { %p1421_p5 = scmp.ne.s32.totalorder %s1825_s7, %s1420_s25  ;;  %p1424_p6 = scmp.lt.u32.totalorder %s1420_s25, %s1825_s7 }
 0x286   :  { %p1426_p7 = pnand %p1424_p6, %p1421_p5 }
 0x288   :  { %1429 = shalt.err (!%p1426_p7)
}
 0x289   :  { %s1481_s28 = smov 192   ;;  %s1482_s5 = smov 12  }
 0x28a   :  { %886 = dma.vmem_to_hbm [thread:$0]  %s881_s17, 960, %s1825_s7, [#allocation4], %s1481_s28, %s1481_s28, %s1482_s5  }
 0x28b   :  { %s1483_s2 = smov [#allocation15]  }
 0x28c   :  { %v856_v20 = vpop.f32.mrb[24].mxu1  ;;  %s892_s11 = sshll.u32 %s1483_s2, 4  ;;  %s893_s11 = int_to_ptr.vmem [resolvable:$true] %s892_s11 }
 0x28d   :  { %872 = vst [vmem:[#allocation15 + $0x10] sm:$0xff] %v856_v20  ;;  %v1168_v21 = vpop.f32.mrb[25].mxu1  ;;  %s1430_s13 = scalar_lea.vmem %s893_s11, 640  ;;  %p1435_p9 = scmp.lt.s32.totalorder %s893_s11, %s893_s11 }
 0x28e   :  { %v859_v22 = vpop.f32.mrb[26].mxu1  ;;  %p1431_p8 = scmp.ne.s32.totalorder %s893_s11, %s1430_s13  ;;  %p1436_p10 = scmp.lt.s32.totalorder %s1430_s13, %s1430_s13 }
 0x28f   :  { %873 = vst [vmem:[#allocation15 + $0x18] sm:$0xff] %v859_v22  ;;  %v1169_v23 = vpop.f32.mrb[27].mxu1 }
 0x290   :  { %p1437_p11 = por %p1436_p10, %p1435_p9 }
 0x292   :  { %p1438_p12 = pnand %p1437_p11, %p1431_p8 }
 0x294   :  { %v864_v24 = vpop.f32.mrb[28].mxu1 }
 0x295   :  { %874 = vst [vmem:[#allocation15 + $0x20] sm:$0xff] %v864_v24  ;;  %v1172_v25 = vpop.f32.mrb[29].mxu1 }
 0x296   :  { %v867_v26 = vpop.f32.mrb[30].mxu1 }
 0x297   :  { %1441 = shalt.err (!%p1438_p12)
}
 0x298   :  { %s1442_s15 = scalar_lea.hbm %s1826_s8, 640 }
 0x299   :  { %p1443_p13 = scmp.ne.s32.totalorder %s1826_s8, %s1442_s15  ;;  %p1446_p0 = scmp.lt.u32.totalorder %s1442_s15, %s1826_s8 }
 0x29b   :  { %p1448_p1 = pnand %p1446_p0, %p1443_p13 }
 0x29d   :  { %1451 = shalt.err (!%p1448_p1)
}
 0x29e   :  { %898 = dma.vmem_to_hbm [thread:$0]  %s893_s11, 640, %s1826_s8, [#allocation16], %s1471_s0, %s1471_s0, %s1472_s12   ;;  %v1173_v27 = vpop.f32.mrb[31].mxu1 }
 0x29f   :  { %1460 = dma.done.wait [#allocation4], 960  }
 0x2a0   :  { %1461 = vsyncadd [#allocation4], 4294966336 }
 0x2a1   :  { %1462 = dma.done.wait [#allocation16], 640  }
 0x2a2   :  { %1463 = vsyncadd [#allocation16], 4294966656 }
 0x2a3   :  { %905 = vsyncpa [#allocation3], 1 }
 0x2a4   :  { %906 = vsyncpa [#allocation6], 1 }
 0x2a5   :  { %907 = vsyncpa [#allocation9], 1 }
 0x2a6   :  { %908 = vsyncpa [#allocation12], 1 }
 0x2a7   :  { %909 = vsyncpa [#allocation4], 1 }
 0x2a8   :  { %910 = vsyncpa [#allocation16], 1 }

</bundles_post_ra>
